<compile_context>
chip_gen: v6e
topology: v6e:2x2x1
jax: 0.10.0
libtpu: 0.0.40
codegen_flags: <defaults>
</compile_context>

<pallas_src>
import jax
import jax.numpy as jnp
from jax.experimental import pallas as pl
from jax.experimental.pallas import tpu as pltpu


def _qcritic_kernel(s_ref, a_ref, w1s_ref, w1a_ref, b1_ref, w2_ref, b2_ref,
                    out_ref):
    # s_ref  : (TM, S)   a_ref  : (TM, A)          (caller dtype)
    # w1s_ref: (H, S)    w1a_ref: (H, A)    b1_ref: (H, 1)      (f32)
    # w2_ref : (H, 1)    b2_ref : (1,) scalar in SMEM           (f32)
    # out_ref: (1, TM)   -- batch on the lane axis (lane-dense stores)
    contract_last = (((1,), (1,)), ((), ()))  # (H,K) x (TM,K) -> (H,TM)

    # In-kernel promotion to f32 (no-op for f32 inputs; handles bf16 callers).
    s = s_ref[...].astype(jnp.float32)
    a = a_ref[...].astype(jnp.float32)

    # Layer 1: h[j, m] = sum_k W1[j, k] * x[m, k]   (f32 MXU accumulation).
    h = jax.lax.dot_general(w1s_ref[...], s, contract_last,
                            preferred_element_type=jnp.float32)
    h = h + jax.lax.dot_general(w1a_ref[...], a, contract_last,
                                preferred_element_type=jnp.float32)
    h = h + b1_ref[...]                      # (H,1) broadcast over lanes
    h = jnp.maximum(h, 0.0)                  # ReLU on the VPU (f32)

    # Layer 2 (48 -> 1): broadcast-multiply + sublane reduce -> (1, TM).
    out = jnp.sum(h * w2_ref[...], axis=0, keepdims=True) + b2_ref[0]
    out_ref[...] = out.astype(out_ref.dtype)


def _choose_tile(batch, block_b):
    """Pick the batch-tile size.

    - batch <= 1024: single full-array tile (exempt from 8/128 divisibility;
      splitting tiny batches only adds per-step pipeline overhead).
    - larger batches: at least two tiles (v7x megacore), each a multiple of
      128 lanes (lane-dense output stores), capped at block_b rows.
    """
    if batch <= 1024:
        return batch
    tm = min(block_b, pl.cdiv(batch, 2))
    tm = max(128, (tm // 128) * 128)
    return tm


def qcritic_forward(state, action, w1, b1, w2, b2, *, block_b=2048):
    """QCritic forward pass.

    state : (B, S), action : (B, A)     (f32 or bf16; used as supplied)
    w1 : (H, S+A), b1 : (H,)            -- torch nn.Linear layout (out_f, in_f)
    w2 : (1, H),   b2 : (1,)
    Returns (B, 1) float32.
    """
    B, S = state.shape
    A = action.shape[1]
    H, d_in = w1.shape
    assert d_in == S + A and w2.shape == (1, H)

    # One-off parameter plumbing: split W1, lay bias / w2 out as columns.
    # Weights stay f32 (tiny, VMEM-resident across the whole grid).
    w1s = w1[:, :S].astype(jnp.float32)
    w1a = w1[:, S:].astype(jnp.float32)
    b1c = b1.reshape(H, 1).astype(jnp.float32)
    w2c = w2.reshape(H, 1).astype(jnp.float32)
    b2s = b2.reshape(1).astype(jnp.float32)   # 1-D scalar for SMEM (4 bytes)

    tm = _choose_tile(B, block_b)
    n_tiles = pl.cdiv(B, tm)

    # Advisory cost for XLA's scheduler around this short, mem-bound kernel.
    in_itemsize = jnp.dtype(state.dtype).itemsize
    cost = pl.CostEstimate(
        flops=2 * B * H * (S + A) + 2 * B * H,
        transcendentals=0,
        bytes_accessed=B * (S + A) * in_itemsize + B * 4 + (H * (d_in + 2)) * 4,
    )

    # vmem_limit_bytes only when sweeping very large tiles (> 4k rows); the
    # default 2048-row tile (~2.2 KiB/row incl. lane padding + double buffers)
    # fits every generation's default scoped VMEM.
    vmem_limit = None
    if tm > 4096:
        vmem_limit = int(min((2304 * tm * 5) // 4 + (4 << 20), 48 << 20))
    cp_kwargs = dict(dimension_semantics=("parallel",))
    if vmem_limit is not None:
        cp_kwargs["vmem_limit_bytes"] = vmem_limit

    out_row = pl.pallas_call(
        _qcritic_kernel,
        out_shape=jax.ShapeDtypeStruct((1, B), jnp.float32),
        grid=(n_tiles,),
        in_specs=[
            pl.BlockSpec((tm, S), lambda i: (i, 0)),           # state tile
            pl.BlockSpec((tm, A), lambda i: (i, 0)),           # action tile
            pl.BlockSpec((H, S), lambda i: (0, 0)),            # W1[:, :S] (VMEM-resident)
            pl.BlockSpec((H, A), lambda i: (0, 0)),            # W1[:, S:]
            pl.BlockSpec((H, 1), lambda i: (0, 0)),            # b1 column
            pl.BlockSpec((H, 1), lambda i: (0, 0)),            # w2 column
            pl.BlockSpec(memory_space=pltpu.MemorySpace.SMEM), # b2 scalar (1,)
        ],
        out_specs=pl.BlockSpec((1, tm), lambda i: (0, i)),
        compiler_params=pltpu.CompilerParams(**cp_kwargs),
        cost_estimate=cost,
    )(state, action, w1s, w1a, b1c, w2c, b2s)

    # (1, B) -> (B, 1): same row-major data, free reshape.
    return out_row.reshape(B, 1)


def qcritic_reference(state, action, w1, b1, w2, b2):
    x = jnp.concatenate([state.astype(jnp.float32),
                         action.astype(jnp.float32)], axis=-1)
    h = jnp.maximum(x @ w1.T + b1, 0.0)
    return h @ w2.T + b2


def init_params(key, state_space, action_space, hidden=48):
    """nn.Linear default init (uniform +-1/sqrt(fan_in)), torch (out,in) layout."""
    d_in = state_space + action_space
    k1, k2, k3, k4 = jax.random.split(key, 4)
    bound1 = 1.0 / jnp.sqrt(d_in)
    bound2 = 1.0 / jnp.sqrt(hidden)
    w1 = jax.random.uniform(k1, (hidden, d_in), jnp.float32, -bound1, bound1)
    b1 = jax.random.uniform(k2, (hidden,), jnp.float32, -bound1, bound1)
    w2 = jax.random.uniform(k3, (1, hidden), jnp.float32, -bound2, bound2)
    b2 = jax.random.uniform(k4, (1,), jnp.float32, -bound2, bound2)
    return w1, b1, w2, b2


# TODO(synk): apply_gradient / Adam update and compute_returns are host-side
# training utilities with no kernel equivalent here; only forward() is fused.

if __name__ == "__main__":
    key = jax.random.PRNGKey(0)
    k_p, k_s, k_a, k_s2, k_a2, k_s3, k_a3 = jax.random.split(key, 7)

    state_space, action_space, hidden = 16, 4, 48
    w1, b1, w2, b2 = init_params(k_p, state_space, action_space, hidden)

    # Small-batch check (single full tile, tm == B).
    batch = 8
    state = jax.random.normal(k_s, (batch, state_space), jnp.float32)
    action = jax.random.normal(k_a, (batch, action_space), jnp.float32)
    out = jax.block_until_ready(qcritic_forward(state, action, w1, b1, w2, b2))
    ref = qcritic_reference(state, action, w1, b1, w2, b2)
    assert out.shape == (batch, 1)
    assert jnp.allclose(out, ref, atol=5e-3, rtol=5e-3), \
        float(jnp.max(jnp.abs(out - ref)))

    # Medium batch (<= 1024): still a single full-array tile.
    batch2 = 700
    state2 = jax.random.normal(k_s2, (batch2, state_space), jnp.float32)
    action2 = jax.random.normal(k_a2, (batch2, action_space), jnp.float32)
    out2 = jax.block_until_ready(
        qcritic_forward(state2, action2, w1, b1, w2, b2))
    ref2 = qcritic_reference(state2, action2, w1, b1, w2, b2)
    assert out2.shape == (batch2, 1)
    assert jnp.allclose(out2, ref2, atol=5e-3, rtol=5e-3), \
        float(jnp.max(jnp.abs(out2 - ref2)))

    # Large batch: multi-tile grid (>= 2 tiles, 128-lane-aligned tm) with a
    # trailing partial tile (masked output stores).
    batch3 = 3000
    state3 = jax.random.normal(k_s3, (batch3, state_space), jnp.float32)
    action3 = jax.random.normal(k_a3, (batch3, action_space), jnp.float32)
    out3 = jax.block_until_ready(
        qcritic_forward(state3, action3, w1, b1, w2, b2))
    ref3 = qcritic_reference(state3, action3, w1, b1, w2, b2)
    assert out3.shape == (batch3, 1)
    assert jnp.allclose(out3, ref3, atol=5e-3, rtol=5e-3), \
        float(jnp.max(jnp.abs(out3 - ref3)))

    # bf16-producer path: inputs already bf16 upstream (no wrapper cast);
    # the kernel promotes to f32 internally. Looser tolerance for the bf16 read.
    out_bf16 = jax.block_until_ready(
        qcritic_forward(state3.astype(jnp.bfloat16),
                        action3.astype(jnp.bfloat16), w1, b1, w2, b2))
    assert jnp.allclose(out_bf16, ref3, atol=5e-2, rtol=5e-2), \
        float(jnp.max(jnp.abs(out_bf16 - ref3)))

    print("KERNEL_OK")
</pallas_src>

<mosaic_0001>
module attributes {stable_mosaic.version = 11 : i64} {
  func.func @_qcritic_kernel(%arg0: i32, %arg1: memref<8x16xf32, #tpu.memory_space<vmem>>, %arg2: memref<8x4xf32, #tpu.memory_space<vmem>>, %arg3: memref<48x16xf32, #tpu.memory_space<vmem>>, %arg4: memref<48x4xf32, #tpu.memory_space<vmem>>, %arg5: memref<48x1xf32, #tpu.memory_space<vmem>>, %arg6: memref<48x1xf32, #tpu.memory_space<vmem>>, %arg7: memref<1xf32, #tpu.memory_space<smem>>, %arg8: memref<1x8xf32, #tpu.memory_space<vmem>>) attributes {dimension_semantics = [#tpu.dimension_semantics<parallel>], iteration_bounds = array<i64: 1>, scalar_prefetch = 0 : i64, scratch_operands = 0 : i64, tpu.core_type = #tpu.core_type<tc>, window_params = [{transform_indices = @transform_0, window_bounds = array<i64: 8, 16>}, {transform_indices = @transform_1, window_bounds = array<i64: 8, 4>}, {pipeline_mode = #tpu.pipeline_mode<synchronous>, transform_indices = @transform_2, window_bounds = array<i64: 48, 16>}, {pipeline_mode = #tpu.pipeline_mode<synchronous>, transform_indices = @transform_3, window_bounds = array<i64: 48, 4>}, {pipeline_mode = #tpu.pipeline_mode<synchronous>, transform_indices = @transform_4, window_bounds = array<i64: 48, 1>}, {pipeline_mode = #tpu.pipeline_mode<synchronous>, transform_indices = @transform_5, window_bounds = array<i64: 48, 1>}, {transform_indices = @transform_6, window_bounds = array<i64: 1>}, {transform_indices = @transform_7, window_bounds = array<i64: 1, 8>}]} {
    %c0 = arith.constant 0 : index
    %c0_0 = arith.constant 0 : index
    %0 = vector.load %arg1[%c0, %c0_0] : memref<8x16xf32, #tpu.memory_space<vmem>>, vector<8x16xf32>
    %c0_1 = arith.constant 0 : index
    %c0_2 = arith.constant 0 : index
    %1 = vector.load %arg2[%c0_1, %c0_2] : memref<8x4xf32, #tpu.memory_space<vmem>>, vector<8x4xf32>
    %c0_3 = arith.constant 0 : index
    %c0_4 = arith.constant 0 : index
    %2 = vector.load %arg3[%c0_3, %c0_4] : memref<48x16xf32, #tpu.memory_space<vmem>>, vector<48x16xf32>
    %cst = arith.constant dense<0.000000e+00> : vector<48x8xf32>
    %3 = tpu.matmul %2, %0, %cst {dimension_numbers = #tpu.dot_dimension_numbers<[1], [1], [0], [0], [0, 0, 1, 0], [], []>} : vector<48x16xf32>, vector<8x16xf32>, vector<48x8xf32> -> vector<48x8xf32>
    %c0_5 = arith.constant 0 : index
    %c0_6 = arith.constant 0 : index
    %4 = vector.load %arg4[%c0_5, %c0_6] : memref<48x4xf32, #tpu.memory_space<vmem>>, vector<48x4xf32>
    %cst_7 = arith.constant dense<0.000000e+00> : vector<48x8xf32>
    %5 = tpu.matmul %4, %1, %cst_7 {dimension_numbers = #tpu.dot_dimension_numbers<[1], [1], [0], [0], [0, 0, 1, 0], [], []>} : vector<48x4xf32>, vector<8x4xf32>, vector<48x8xf32> -> vector<48x8xf32>
    %6 = arith.addf %3, %5 : vector<48x8xf32>
    %c0_8 = arith.constant 0 : index
    %c0_9 = arith.constant 0 : index
    %7 = vector.load %arg5[%c0_8, %c0_9] : memref<48x1xf32, #tpu.memory_space<vmem>>, vector<48x1xf32>
    %8 = vector.broadcast %7 : vector<48x1xf32> to vector<48x8xf32>
    %9 = arith.addf %6, %8 : vector<48x8xf32>
    %cst_10 = arith.constant 0.000000e+00 : f32
    %10 = vector.broadcast %cst_10 : f32 to vector<48x8xf32>
    %11 = arith.maximumf %9, %10 : vector<48x8xf32>
    %c0_11 = arith.constant 0 : index
    %c0_12 = arith.constant 0 : index
    %12 = vector.load %arg6[%c0_11, %c0_12] : memref<48x1xf32, #tpu.memory_space<vmem>>, vector<48x1xf32>
    %13 = vector.broadcast %12 : vector<48x1xf32> to vector<48x8xf32>
    %14 = arith.mulf %11, %13 : vector<48x8xf32>
    %cst_13 = arith.constant dense<0.000000e+00> : vector<8xf32>
    %15 = vector.multi_reduction <add>, %14, %cst_13 [0] : vector<48x8xf32> to vector<8xf32>
    %16 = vector.shape_cast %15 : vector<8xf32> to vector<1x8xf32>
    %c0_14 = arith.constant 0 : index
    %17 = memref.load %arg7[%c0_14] : memref<1xf32, #tpu.memory_space<smem>>
    %18 = vector.broadcast %17 : f32 to vector<1x8xf32>
    %19 = arith.addf %16, %18 : vector<1x8xf32>
    %c0_15 = arith.constant 0 : index
    %c0_16 = arith.constant 0 : index
    %20 = vector.load %arg8[%c0_15, %c0_16] : memref<1x8xf32, #tpu.memory_space<vmem>>, vector<1x8xf32>
    tpu.vector_store %arg8[%c0_15, %c0_16], %19 {strides = array<i32>} : memref<1x8xf32, #tpu.memory_space<vmem>>, vector<1x8xf32>,
    return
  }
  func.func @transform_0(%arg0: i32) -> (i32, i32) {
    %c0_i32 = arith.constant 0 : i32
    %c0_i32_0 = arith.constant 0 : i32
    return %arg0, %c0_i32 : i32, i32
  }
  func.func @transform_1(%arg0: i32) -> (i32, i32) {
    %c0_i32 = arith.constant 0 : i32
    %c0_i32_0 = arith.constant 0 : i32
    return %arg0, %c0_i32 : i32, i32
  }
  func.func @transform_2(%arg0: i32) -> (i32, i32) {
    %c0_i32 = arith.constant 0 : i32
    %c0_i32_0 = arith.constant 0 : i32
    %c0_i32_1 = arith.constant 0 : i32
    return %c0_i32, %c0_i32_0 : i32, i32
  }
  func.func @transform_3(%arg0: i32) -> (i32, i32) {
    %c0_i32 = arith.constant 0 : i32
    %c0_i32_0 = arith.constant 0 : i32
    %c0_i32_1 = arith.constant 0 : i32
    return %c0_i32, %c0_i32_0 : i32, i32
  }
  func.func @transform_4(%arg0: i32) -> (i32, i32) {
    %c0_i32 = arith.constant 0 : i32
    %c0_i32_0 = arith.constant 0 : i32
    %c0_i32_1 = arith.constant 0 : i32
    return %c0_i32, %c0_i32_0 : i32, i32
  }
  func.func @transform_5(%arg0: i32) -> (i32, i32) {
    %c0_i32 = arith.constant 0 : i32
    %c0_i32_0 = arith.constant 0 : i32
    %c0_i32_1 = arith.constant 0 : i32
    return %c0_i32, %c0_i32_0 : i32, i32
  }
  func.func @transform_6(%arg0: i32) -> i32 {
    %c0_i32 = arith.constant 0 : i32
    %c0_i32_0 = arith.constant 0 : i32
    return %c0_i32 : i32
  }
  func.func @transform_7(%arg0: i32) -> (i32, i32) {
    %c0_i32 = arith.constant 0 : i32
    %c0_i32_0 = arith.constant 0 : i32
    return %c0_i32, %arg0 : i32, i32
  }
}

</mosaic_0001>

<bundles_post_ra>
// kernel: tpu_custom_call.1
= control target key start
LH: loop header
LB: loop body
LE: loop exit
PB: predicated region body
PF: predicated region fallthrough
CT: control target
= control target key end

     0   :  { %vm42_vm0 = vcmask 31744   ;;  %vm159_vm1 = vcmask 130048   ;;  %v479_v8 = vmov 0   ;;  %s627_s0 = inlined_call_operand.vmem [shape: f32[8,16], index: 0, kind: input, shape index: {}]   ;;  %s628_s1 = inlined_call_operand.vmem [shape: f32[8,4], index: 1, kind: input, shape index: {}]   ;;  %s629_s2 = inlined_call_operand.vmem [shape: f32[48,16], index: 2, kind: input, shape index: {}]   ;;  %s630_s3 = inlined_call_operand.vmem [shape: f32[48,4], index: 3, kind: input, shape index: {}]   ;;  %s631_s4 = inlined_call_operand.vmem [shape: f32[48,1], index: 4, kind: input, shape index: {}]   ;;  %s632_s5 = inlined_call_operand.vmem [shape: f32[48,1], index: 5, kind: input, shape index: {}]   ;;  %s633_s6 = inlined_call_operand.<no memory space> [shape: f32[1], index: 6, kind: input, shape index: {}]   ;;  %s634_s7 = inlined_call_operand.hbm [shape: f32[1,8], index: 7, kind: output, shape index: {}]  }
   0x1   :  { %v29_v0 = vld [vmem:[%s628_s1] sm:$0xff]  ;;  %v37_v4 = vld [vmem:[%s630_s3 + $0x8] sm:$0xff]  ;;  %v38_v6 = vld [vmem:[%s630_s3 + $0x10] sm:$0xff]  ;;  %455 = vset.pattern.permute.xlu0 %v479_v8  ;;  %456 = vset.pattern.permute.xlu1 %v479_v8 }
   0x2   :  { %v28_v1 = vld [vmem:[%s627_s0] sm:$0xff]  ;;  %431 = vmatprep.subr.msk.mxu0 %vm42_vm0, %v29_v0  ;;  %v31_v5 = vld [vmem:[%s629_s2 + $0x8] sm:$0xff]  ;;  %v32_v7 = vld [vmem:[%s629_s2 + $0x10] sm:$0xff] }
   0x3   :  { %v36_v2 = vld [vmem:[%s630_s3] sm:$0xff]  ;;  %442 = vmatprep.subr.msk.mxu1 %vm159_vm1, %v28_v1  ;;  %432 = vmatpush3.xpose.msk.msra.mxu0 %vm42_vm0, %v29_v0  ;;  %v278_v10 = vld [vmem:[%s631_s4 + $0x10] sm:$0xff]  ;;  %v39_v11 = vld [vmem:[%s630_s3 + $0x18] sm:$0xff] }
   0x4   :  { %v30_v3 = vld [vmem:[%s629_s2] sm:$0xff]  ;;  %443 = vmatpush3.xpose.msk.msra.mxu1 %vm159_vm1, %v28_v1  ;;  %433 = vmatprep.mubr.msk.f32.mxu0 %vm42_vm0, %v36_v2  ;;  %v33_v12 = vld [vmem:[%s629_s2 + $0x18] sm:$0xff]  ;;  %v277_v15 = vld [vmem:[%s631_s4 + $0x8] sm:$0xff] }
   0x5   :  { %444 = vmatprep.mubr.msk.f32.mxu1 %vm159_vm1, %v30_v3  ;;  %v276_v9 = vld [vmem:[%s631_s4] sm:$0xff]  ;;  %294 = vperm.xlu1 %456, %v278_v10   ;;  %v279_v16 = vld [vmem:[%s631_s4 + $0x18] sm:$0xff] }
   0x6   :  { %434 = vmatmul.mubr.msk.f32.vlgmr.msra.gmra.mxu0 %vm42_vm0, %v37_v4  ;;  %v40_v13 = vld [vmem:[%s630_s3 + $0x20] sm:$0xff]  ;;  %284 = vperm.xlu0 %455, %v276_v9  }
   0x7   :  { %445 = vmatmul.mubr.msk.f32.vlgmr.msra.gmra.mxu1 %vm159_vm1, %v31_v5  ;;  %436 = vmatprep.mubr.msk.f32.mxu0 %vm42_vm0, %v38_v6  ;;  %v34_v14 = vld [vmem:[%s629_s2 + $0x20] sm:$0xff] }
   0x8   :  { %447 = vmatprep.mubr.msk.f32.mxu1 %vm159_vm1, %v32_v7 }
   0x9   :  { %13 = vsyncpa [#allocation4], 0  ;;  %v41_v17 = vld [vmem:[%s630_s3 + $0x28] sm:$0xff]  ;;  %299 = vperm.xlu1 %456, %v279_v16   ;;  %v324_v19 = vld [vmem:[%s632_s5] sm:$0xff]  ;;  %vm366_vm2 = vcmask 64512   ;;  %s480_s24 = smov [#allocation3]  }
   0xa   :  { %437 = vmatmul.mubr.msk.f32.gmra.mxu0 %vm42_vm0, %v39_v11  ;;  %v35_v18 = vld [vmem:[%s629_s2 + $0x28] sm:$0xff]  ;;  %289 = vperm.xlu0 %455, %v277_v15   ;;  %v280_v21 = vld [vmem:[%s631_s4 + $0x20] sm:$0xff]  ;;  %v326_v22 = vld [vmem:[%s632_s5 + $0x10] sm:$0xff]  ;;  %s395_s25 = sshll.u32 %s480_s24, 4  ;;  %vm387_vm3 = vcmask 57344   ;;  %s396_s25 = int_to_ptr.vmem [resolvable:$true] %s395_s25 }
   0xb   :  { %448 = vmatmul.mubr.msk.f32.gmra.mxu1 %vm159_vm1, %v33_v12  ;;  %439 = vmatprep.mubr.msk.f32.mxu0 %vm42_vm0, %v40_v13  ;;  %v325_v20 = vld [vmem:[%s632_s5 + $0x8] sm:$0xff]  ;;  %v327_v24 = vld [vmem:[%s632_s5 + $0x18] sm:$0xff]  ;;  %v328_v25 = vld [vmem:[%s632_s5 + $0x20] sm:$0xff]  ;;  %s457_s26 = scalar_lea.vmem %s396_s25, 16  ;;  %s461_s27 = scalar_lea.vmem %s396_s25, 32 }
   0xc   :  { %450 = vmatprep.mubr.msk.f32.mxu1 %vm159_vm1, %v34_v14  ;;  %v281_v23 = vld [vmem:[%s631_s4 + $0x28] sm:$0xff]  ;;  %p458_p0 = scmp.ne.s32.totalorder %s396_s25, %s457_s26  ;;  %p462_p1 = scmp.lt.s32.totalorder %s396_s25, %s396_s25 }
   0xd   :  { %337 = vperm.xlu1 %456, %v325_v20   ;;  %v329_v26 = vld [vmem:[%s632_s5 + $0x28] sm:$0xff]  ;;  %p463_p2 = scmp.lt.s32.totalorder %s461_s27, %s457_s26 }
   0xe   :  { %440 = vmatmul.mubr.msk.f32.gmra.mxu0 %vm42_vm0, %v41_v17  ;;  %332 = vperm.xlu0 %455, %v324_v19  }
   0xf   :  { %451 = vmatmul.mubr.msk.f32.gmra.mxu1 %vm159_vm1, %v35_v18  ;;  %p464_p3 = por %p463_p2, %p462_p1 }
  0x11   :  { %342 = vperm.xlu1 %456, %v326_v22   ;;  %p465_p4 = pnand %p464_p3, %p458_p0 }
  0x12   :  { %304 = vperm.xlu0 %455, %v280_v21  }
  0x15   :  { %347 = vperm.xlu1 %456, %v327_v24  }
  0x16   :  { %309 = vperm.xlu0 %455, %v281_v23  }
  0x19   :  { %357 = vperm.xlu1 %456, %v329_v26  }
  0x1a   :  { %352 = vperm.xlu0 %455, %v328_v25  }
  0x80   :  { %v295_v28 = vpop.permute.xlu1 %294 }
  0x81   :  { %v285_v27 = vpop.permute.xlu0 %284 }
  0x84   :  { %v300_v30 = vpop.permute.xlu1 %299 }
  0x85   :  { %v290_v29 = vpop.permute.xlu0 %289 }
  0x88   :  { %v338_v32 = vpop.permute.xlu1 %337 }
  0x89   :  { %v333_v31 = vpop.permute.xlu0 %332 }
  0x8c   :  { %v343_v39 = vpop.permute.xlu1 %342 }
  0x8d   :  { %v305_v38 = vpop.permute.xlu0 %304 }
  0x90   :  { %v348_v55 = vpop.permute.xlu1 %347 }
  0x91   :  { %v310_v54 = vpop.permute.xlu0 %309 }
  0x94   :  { %v358_v12 = vpop.permute.xlu1 %357 }
  0x95   :  { %v353_v11 = vpop.permute.xlu0 %352 }
  0xc6   :  { %v435_v33 = vpop.f32.mrf.mxu0 }
  0xc7   :  { %v446_v34 = vpop.f32.mrf.mxu1 }
  0xc8   :  { %v253_v35 = vadd.f32 %v446_v34, %v435_v33  ;;  %v130_v36 = vpop.f32.mrf.mxu0 }
  0xc9   :  { %v247_v37 = vpop.f32.mrf.mxu1 }
  0xca   :  { %v313_v40 = vadd.f32 %v290_v29, %v253_v35  ;;  %v248_v41 = vadd.f32 %v247_v37, %v130_v36  ;;  %v438_v42 = vpop.f32.mrf.mxu0 }
  0xcb   :  { %v449_v43 = vpop.f32.mrf.mxu1 }
  0xcc   :  { %v319_v44 = vmax.f32 %v313_v40, 0.0  ;;  %v312_v45 = vadd.f32 %v285_v27, %v248_v41  ;;  %v263_v46 = vadd.f32 %v449_v43, %v438_v42  ;;  %v140_v47 = vpop.f32.mrf.mxu0  ;;  %v385_v27 = vstv %s633_s6 }
  0xcd   :  { %v257_v48 = vpop.f32.mrf.mxu1 }
  0xce   :  { %v318_v49 = vmax.f32 %v312_v45, 0.0  ;;  %v315_v50 = vadd.f32 %v300_v30, %v263_v46  ;;  %v258_v51 = vadd.f32 %v257_v48, %v140_v47  ;;  %v441_v52 = vpop.f32.mrf.mxu0  ;;  %v361_v56 = vmul.f32 %v338_v32, %v319_v44 }
  0xcf   :  { %v452_v53 = vpop.f32.mrf.mxu1 }
  0xd0   :  { %v360_v57 = vmul.f32 %v333_v31, %v318_v49  ;;  %v321_v58 = vmax.f32 %v315_v50, 0.0  ;;  %v314_v59 = vadd.f32 %v295_v28, %v258_v51  ;;  %v273_v60 = vadd.f32 %v452_v53, %v441_v52  ;;  %v150_v61 = vpop.f32.mrf.mxu0 }
  0xd1   :  { %v267_v62 = vpop.f32.mrf.mxu1  ;;  %v368_v3 = vsel %vm366_vm2, %v361_v56, 0.0 }
  0xd2   :  { %v367_v63 = vsel %vm366_vm2, %v360_v57, 0.0  ;;  %v320_v0 = vmax.f32 %v314_v59, 0.0  ;;  %v268_v1 = vadd.f32 %v267_v62, %v150_v61  ;;  %v317_v2 = vadd.f32 %v310_v54, %v273_v60 }
  0xd3   :  { %v363_v4 = vmul.f32 %v348_v55, %v321_v58  ;;  %v369_v7 = vadd.f32 %v368_v3, %v367_v63 }
  0xd4   :  { %v362_v5 = vmul.f32 %v343_v39, %v320_v0  ;;  %v316_v6 = vadd.f32 %v305_v38, %v268_v1  ;;  %v323_v8 = vmax.f32 %v317_v2, 0.0 }
  0xd5   :  { %v372_v14 = vsel %vm366_vm2, %v363_v4, 0.0 }
  0xd6   :  { %v370_v9 = vsel %vm366_vm2, %v362_v5, 0.0  ;;  %v322_v10 = vmax.f32 %v316_v6, 0.0  ;;  %v365_v15 = vmul.f32 %v358_v12, %v323_v8 }
  0xd7   :  { %v371_v13 = vadd.f32 %v370_v9, %v369_v7 }
  0xd8   :  { %v364_v16 = vmul.f32 %v353_v11, %v322_v10  ;;  %v376_v20 = vsel %vm366_vm2, %v365_v15, 0.0 }
  0xd9   :  { %v373_v17 = vadd.f32 %v372_v14, %v371_v13 }
  0xda   :  { %v374_v18 = vsel %vm366_vm2, %v364_v16, 0.0 }
  0xdb   :  { %v375_v19 = vadd.f32 %v374_v18, %v373_v17 }
  0xdd   :  { %v377_v21 = vadd.f32 %v376_v20, %v375_v19 }
  0xdf   :  { %v378_v22 = vrot.slane %v377_v21, 4 }
  0xe1   :  { %v379_v23 = vadd.f32 %v378_v22, %v377_v21 }
  0xe3   :  { %v380_v24 = vrot.slane %v379_v23, 2 }
  0xe5   :  { %v381_v25 = vadd.f32 %v380_v24, %v379_v23 }
  0xe7   :  { %v382_v26 = vrot.slane %v381_v25, 1 }
  0xe9   :  { %v383_v28 = vadd.f32 %v382_v26, %v381_v25 }
  0xeb   :  { %v386_v29 = vadd.f32 %v385_v27, %v383_v28 }
  0xed   :  { %388 = vst.msk [vmem:[#allocation3] sm:$0x1] %vm387_vm3, %v386_v29 }
  0xee   :  { %468 = shalt.err (!%p465_p4)
}
  0xef   :  { %398 = dma.vmem_to_hbm [thread:$0]  %s396_s25, 16, %s634_s7, [#allocation4]  }
  0xf0   :  { %477 = dma.done.wait [#allocation4], 16  }
  0xf1   :  { %478 = vsyncadd [#allocation4], 4294967280 }
  0xf2   :  { %402 = vsyncpa [#allocation4], 1 }

</bundles_post_ra>
